<compile_context>
chip_gen: v7x
topology: tpu7x:2x2x1
jax: 0.10.0
libtpu: 0.0.40
codegen_flags: <defaults>
</compile_context>

<pallas_src>
import jax
import jax.numpy as jnp
from jax.experimental import pallas as pl
from jax.experimental.pallas import tpu as pltpu


def _round_up(x: int, m: int) -> int:
    return ((x + m - 1) // m) * m


def _is_multi_tensorcore_chip() -> bool:
    """True on chips where dimension_semantics=('parallel',) can shard one grid
    axis across >1 TensorCore (v4/v5p megacore, v7x).  v5e/v6e have a single TC,
    so splitting a small batch there only adds a second ~0.35 us grid step."""
    try:
        dev = jax.devices()[0]
        if dev.platform != "tpu":
            return False
        kind = dev.device_kind.lower()
    except Exception:
        return False
    return any(tag in kind for tag in ("v4", "v5p", "v7", "7x", "tpu7"))


def featurenet_kernel(x_ref, w1_ref, b1_ref, w2_ref, b2_ref, w3_ref, b3_ref, o_ref):
    # Fused 3-layer MLP on one batch tile.  Weights/biases have constant index_maps,
    # so they are fetched once and stay VMEM-resident across all batch tiles.
    h = jnp.dot(x_ref[...], w1_ref[...], preferred_element_type=jnp.float32)
    h = jnp.maximum(h + b1_ref[...], 0.0)
    h = jnp.dot(h.astype(w2_ref.dtype), w2_ref[...], preferred_element_type=jnp.float32)
    h = jnp.maximum(h + b2_ref[...], 0.0)
    h = jnp.dot(h.astype(w3_ref.dtype), w3_ref[...], preferred_element_type=jnp.float32)
    o_ref[...] = (h + b3_ref[...]).astype(o_ref.dtype)


def featurenet_forward(x, params, *, tm=4096, compute_dtype=None):
    """Fused FeatureNet forward.

    x:      (batch, input_dim) float32.
    params: dict w{1,2,3} (in, out), b{1,2,3} (out,)  -> y = x @ W + b.
    tm:     target original batch rows per grid step.  ~2K-4K amortises per-step
            pipeline overhead; VMEM use at tm=4096 is a few MiB.  If you raise tm
            beyond ~8192, also pass pltpu.CompilerParams(vmem_limit_bytes=...)
            (v5e's default scoped VMEM is 16 MiB).
    compute_dtype: optionally jnp.bfloat16 (v6e/v7x): halves x/W HBM traffic and
            uses the bf16 MXU path; accumulation stays f32.  Numerics differ
            slightly from the f32 PyTorch reference.
    """
    w1, b1, w2, b2, w3, b3 = (params[k] for k in ("w1", "b1", "w2", "b2", "w3", "b3"))
    M, Din = x.shape
    H1, H2, Dout = w1.shape[1], w2.shape[1], w3.shape[1]
    out_dtype = x.dtype
    cdt = jnp.dtype(compute_dtype) if compute_dtype is not None else jnp.dtype(x.dtype)

    # ---- lane-dense row packing ------------------------------------------------
    # Dout=32 would make the output only 32/128 lanes wide (masked stores +
    # lane-sparse writeback).  Pack `pack` consecutive rows into lanes instead:
    # free wrapper reshape of x + block-diagonal weights => dense 128-lane output.
    pack = 128 // Dout if (0 < Dout <= 128 and 128 % Dout == 0) else 1
    if pack > 1 and (M % pack != 0 or M == 0):
        pack = 1  # ragged w.r.t. pack: plain layout fallback (still no pad/slice)

    if pack > 1:
        eye = jnp.eye(pack, dtype=w1.dtype)
        w1, w2, w3 = (jnp.kron(eye, w) for w in (w1, w2, w3))  # block-diagonal
        b1, b2, b3 = (jnp.tile(b, pack) for b in (b1, b2, b3))
        x = x.reshape(M // pack, pack * Din)  # free row-major reshape

    rows, cols_in = x.shape
    cols_out = pack * Dout

    xw = x.astype(cdt)
    w1c, w2c, w3c = (w.astype(cdt) for w in (w1, w2, w3))
    b1r, b2r, b3r = (b.astype(jnp.float32).reshape(1, -1) for b in (b1, b2, b3))

    # ---- batch-tile (rows per grid step) ----------------------------------------
    row_align = max(8, 32 // cdt.itemsize)          # sublane alignment (16 for bf16)
    req = max(1, tm // pack)
    row_block = max(row_align, min(_round_up(req, row_align), _round_up(rows, row_align)))
    if _is_multi_tensorcore_chip() and pl.cdiv(rows, row_block) < 2 and rows >= 2 * row_align:
        # Give the second TensorCore a grid step (v4/v5p/v7x only).
        row_block = _round_up(pl.cdiv(rows, 2), row_align)
    grid_m = pl.cdiv(rows, row_block)  # partial final block handled by Pallas masking

    cost = pl.CostEstimate(
        flops=2 * M * (Din * H1 + H1 * H2 + H2 * Dout),
        transcendentals=0,
        bytes_accessed=(
            M * Din * cdt.itemsize
            + M * Dout * jnp.dtype(out_dtype).itemsize
            + sum(int(w.size) * w.dtype.itemsize for w in (w1c, w2c, w3c))
        ),
    )

    in_specs = [
        pl.BlockSpec((row_block, cols_in), lambda i: (i, 0)),   # streamed x tile
        # Grid-invariant weights/biases: constant index_maps -> loaded once,
        # resident in VMEM for every batch tile (no per-step re-DMA).
        pl.BlockSpec(w1c.shape, lambda i: (0, 0)),
        pl.BlockSpec(b1r.shape, lambda i: (0, 0)),
        pl.BlockSpec(w2c.shape, lambda i: (0, 0)),
        pl.BlockSpec(b2r.shape, lambda i: (0, 0)),
        pl.BlockSpec(w3c.shape, lambda i: (0, 0)),
        pl.BlockSpec(b3r.shape, lambda i: (0, 0)),
    ]
    out_specs = pl.BlockSpec((row_block, cols_out), lambda i: (i, 0))

    out = pl.pallas_call(
        featurenet_kernel,
        out_shape=jax.ShapeDtypeStruct((rows, cols_out), out_dtype),
        grid=(grid_m,),
        in_specs=in_specs,
        out_specs=out_specs,
        compiler_params=pltpu.CompilerParams(
            dimension_semantics=("parallel",),
        ),
        cost_estimate=cost,
    )(xw, w1c, b1r, w2c, b2r, w3c, b3r)

    # Free metadata reshape back to the module's (batch, latent_dim) contract.
    return out.reshape(M, Dout) if pack > 1 else out


def init_params(key, input_dim, latent_dim, hidden_dims=(64, 64)):
    """Deterministic init mimicking nn.Linear's default (uniform +/- 1/sqrt(fan_in))."""
    dims = [input_dim, *hidden_dims, latent_dim]
    params = {}
    for idx in range(3):
        fan_in, fan_out = dims[idx], dims[idx + 1]
        key, kw, kb = jax.random.split(key, 3)
        bound = 1.0 / (fan_in ** 0.5)
        params[f"w{idx+1}"] = jax.random.uniform(
            kw, (fan_in, fan_out), jnp.float32, -bound, bound)
        params[f"b{idx+1}"] = jax.random.uniform(
            kb, (fan_out,), jnp.float32, -bound, bound)
    return params


def reference_forward(x, params):
    h = jnp.maximum(x @ params["w1"] + params["b1"], 0.0)
    h = jnp.maximum(h @ params["w2"] + params["b2"], 0.0)
    return h @ params["w3"] + params["b3"]


if __name__ == "__main__":
    key = jax.random.PRNGKey(0)
    input_dim, latent_dim = 16, 32

    kx, kp = jax.random.split(key)
    params = init_params(kp, input_dim, latent_dim)

    # batch=8   : packed lane-dense path, single grid step.
    # batch=300 : packed path, ragged vs. row tile (partial final block, no pad/slice).
    # batch=37  : not a multiple of pack -> unpacked fallback, partial final block.
    for batch in (8, 300, 37):
        kx, sub = jax.random.split(kx)
        x = jax.random.normal(sub, (batch, input_dim), jnp.float32)

        out = jax.block_until_ready(featurenet_forward(x, params))
        ref = reference_forward(x, params)

        assert out.shape == (batch, latent_dim), out.shape
        assert jnp.allclose(out, ref, atol=1e-4, rtol=1e-4), \
            f"mismatch vs JAX reference at batch={batch}"

    # bf16-compute option (v6e/v7x traffic/MXU win); looser tolerance vs f32 reference.
    x = jax.random.normal(kx, (256, input_dim), jnp.float32)
    out_bf16 = jax.block_until_ready(
        featurenet_forward(x, params, compute_dtype=jnp.bfloat16))
    ref = reference_forward(x, params)
    assert out_bf16.shape == (256, latent_dim)
    assert jnp.allclose(out_bf16, ref, atol=0.15, rtol=0.1), "bf16 path mismatch"

    print("KERNEL_OK")
</pallas_src>

<mosaic_0001>
module attributes {stable_mosaic.version = 11 : i64} {
  func.func @featurenet_kernel(%arg0: i32, %arg1: memref<8x64xf32, #tpu.memory_space<vmem>>, %arg2: memref<64x256xf32, #tpu.memory_space<vmem>>, %arg3: memref<1x256xf32, #tpu.memory_space<vmem>>, %arg4: memref<256x256xf32, #tpu.memory_space<vmem>>, %arg5: memref<1x256xf32, #tpu.memory_space<vmem>>, %arg6: memref<256x128xf32, #tpu.memory_space<vmem>>, %arg7: memref<1x128xf32, #tpu.memory_space<vmem>>, %arg8: memref<8x128xf32, #tpu.memory_space<vmem>>) attributes {dimension_semantics = [#tpu.dimension_semantics<parallel>], iteration_bounds = array<i64: 1>, scalar_prefetch = 0 : i64, scratch_operands = 0 : i64, tpu.core_type = #tpu.core_type<tc>, window_params = [{transform_indices = @transform_0, window_bounds = array<i64: 8, 64>}, {pipeline_mode = #tpu.pipeline_mode<synchronous>, transform_indices = @transform_1, window_bounds = array<i64: 64, 256>}, {pipeline_mode = #tpu.pipeline_mode<synchronous>, transform_indices = @transform_2, window_bounds = array<i64: 1, 256>}, {pipeline_mode = #tpu.pipeline_mode<synchronous>, transform_indices = @transform_3, window_bounds = array<i64: 256, 256>}, {pipeline_mode = #tpu.pipeline_mode<synchronous>, transform_indices = @transform_4, window_bounds = array<i64: 1, 256>}, {pipeline_mode = #tpu.pipeline_mode<synchronous>, transform_indices = @transform_5, window_bounds = array<i64: 256, 128>}, {pipeline_mode = #tpu.pipeline_mode<synchronous>, transform_indices = @transform_6, window_bounds = array<i64: 1, 128>}, {transform_indices = @transform_7, window_bounds = array<i64: 8, 128>}]} {
    %c0 = arith.constant 0 : index
    %c0_0 = arith.constant 0 : index
    %0 = vector.load %arg1[%c0, %c0_0] : memref<8x64xf32, #tpu.memory_space<vmem>>, vector<8x64xf32>
    %c0_1 = arith.constant 0 : index
    %c0_2 = arith.constant 0 : index
    %1 = vector.load %arg2[%c0_1, %c0_2] : memref<64x256xf32, #tpu.memory_space<vmem>>, vector<64x256xf32>
    %cst = arith.constant dense<0.000000e+00> : vector<8x256xf32>
    %2 = tpu.matmul %0, %1, %cst {dimension_numbers = #tpu.dot_dimension_numbers<[1], [0], [0], [1], [0, 0, 1, 1], [], []>} : vector<8x64xf32>, vector<64x256xf32>, vector<8x256xf32> -> vector<8x256xf32>
    %c0_3 = arith.constant 0 : index
    %c0_4 = arith.constant 0 : index
    %3 = vector.load %arg3[%c0_3, %c0_4] : memref<1x256xf32, #tpu.memory_space<vmem>>, vector<1x256xf32>
    %4 = vector.broadcast %3 : vector<1x256xf32> to vector<8x256xf32>
    %5 = arith.addf %2, %4 : vector<8x256xf32>
    %cst_5 = arith.constant 0.000000e+00 : f32
    %6 = vector.broadcast %cst_5 : f32 to vector<8x256xf32>
    %7 = arith.maximumf %5, %6 : vector<8x256xf32>
    %c0_6 = arith.constant 0 : index
    %c0_7 = arith.constant 0 : index
    %8 = vector.load %arg4[%c0_6, %c0_7] : memref<256x256xf32, #tpu.memory_space<vmem>>, vector<256x256xf32>
    %cst_8 = arith.constant dense<0.000000e+00> : vector<8x256xf32>
    %9 = tpu.matmul %7, %8, %cst_8 {dimension_numbers = #tpu.dot_dimension_numbers<[1], [0], [0], [1], [0, 0, 1, 1], [], []>} : vector<8x256xf32>, vector<256x256xf32>, vector<8x256xf32> -> vector<8x256xf32>
    %c0_9 = arith.constant 0 : index
    %c0_10 = arith.constant 0 : index
    %10 = vector.load %arg5[%c0_9, %c0_10] : memref<1x256xf32, #tpu.memory_space<vmem>>, vector<1x256xf32>
    %11 = vector.broadcast %10 : vector<1x256xf32> to vector<8x256xf32>
    %12 = arith.addf %9, %11 : vector<8x256xf32>
    %cst_11 = arith.constant 0.000000e+00 : f32
    %13 = vector.broadcast %cst_11 : f32 to vector<8x256xf32>
    %14 = arith.maximumf %12, %13 : vector<8x256xf32>
    %c0_12 = arith.constant 0 : index
    %c0_13 = arith.constant 0 : index
    %15 = vector.load %arg6[%c0_12, %c0_13] : memref<256x128xf32, #tpu.memory_space<vmem>>, vector<256x128xf32>
    %cst_14 = arith.constant dense<0.000000e+00> : vector<8x128xf32>
    %16 = tpu.matmul %14, %15, %cst_14 {dimension_numbers = #tpu.dot_dimension_numbers<[1], [0], [0], [1], [0, 0, 1, 1], [], []>} : vector<8x256xf32>, vector<256x128xf32>, vector<8x128xf32> -> vector<8x128xf32>
    %c0_15 = arith.constant 0 : index
    %c0_16 = arith.constant 0 : index
    %17 = vector.load %arg7[%c0_15, %c0_16] : memref<1x128xf32, #tpu.memory_space<vmem>>, vector<1x128xf32>
    %18 = vector.broadcast %17 : vector<1x128xf32> to vector<8x128xf32>
    %19 = arith.addf %16, %18 : vector<8x128xf32>
    %c0_17 = arith.constant 0 : index
    %c0_18 = arith.constant 0 : index
    %20 = vector.load %arg8[%c0_17, %c0_18] : memref<8x128xf32, #tpu.memory_space<vmem>>, vector<8x128xf32>
    tpu.vector_store %arg8[%c0_17, %c0_18], %19 {strides = array<i32>} : memref<8x128xf32, #tpu.memory_space<vmem>>, vector<8x128xf32>,
    return
  }
  func.func @transform_0(%arg0: i32) -> (i32, i32) {
    %c0_i32 = arith.constant 0 : i32
    %c0_i32_0 = arith.constant 0 : i32
    return %arg0, %c0_i32 : i32, i32
  }
  func.func @transform_1(%arg0: i32) -> (i32, i32) {
    %c0_i32 = arith.constant 0 : i32
    %c0_i32_0 = arith.constant 0 : i32
    %c0_i32_1 = arith.constant 0 : i32
    return %c0_i32, %c0_i32_0 : i32, i32
  }
  func.func @transform_2(%arg0: i32) -> (i32, i32) {
    %c0_i32 = arith.constant 0 : i32
    %c0_i32_0 = arith.constant 0 : i32
    %c0_i32_1 = arith.constant 0 : i32
    return %c0_i32, %c0_i32_0 : i32, i32
  }
  func.func @transform_3(%arg0: i32) -> (i32, i32) {
    %c0_i32 = arith.constant 0 : i32
    %c0_i32_0 = arith.constant 0 : i32
    %c0_i32_1 = arith.constant 0 : i32
    return %c0_i32, %c0_i32_0 : i32, i32
  }
  func.func @transform_4(%arg0: i32) -> (i32, i32) {
    %c0_i32 = arith.constant 0 : i32
    %c0_i32_0 = arith.constant 0 : i32
    %c0_i32_1 = arith.constant 0 : i32
    return %c0_i32, %c0_i32_0 : i32, i32
  }
  func.func @transform_5(%arg0: i32) -> (i32, i32) {
    %c0_i32 = arith.constant 0 : i32
    %c0_i32_0 = arith.constant 0 : i32
    %c0_i32_1 = arith.constant 0 : i32
    return %c0_i32, %c0_i32_0 : i32, i32
  }
  func.func @transform_6(%arg0: i32) -> (i32, i32) {
    %c0_i32 = arith.constant 0 : i32
    %c0_i32_0 = arith.constant 0 : i32
    %c0_i32_1 = arith.constant 0 : i32
    return %c0_i32, %c0_i32_0 : i32, i32
  }
  func.func @transform_7(%arg0: i32) -> (i32, i32) {
    %c0_i32 = arith.constant 0 : i32
    %c0_i32_0 = arith.constant 0 : i32
    return %arg0, %c0_i32 : i32, i32
  }
}

</mosaic_0001>

<bundles_post_ra>
// kernel: tpu_custom_call.1
= control target key start
LH: loop header
LB: loop body
LE: loop exit
PB: predicated region body
PF: predicated region fallthrough
CT: control target
= control target key end

     0   :  { %12 = vsyncpa [#allocation3], 0  ;;  %s885_s0 = inlined_call_operand.hbm [shape: f32[2,64], index: 0, kind: input, shape index: {}]   ;;  %s886_s1 = inlined_call_operand.hbm [shape: f32[64,256], index: 1, kind: input, shape index: {}]   ;;  %s887_s2 = inlined_call_operand.vmem [shape: f32[1,256], index: 2, kind: input, shape index: {}]   ;;  %s888_s3 = inlined_call_operand.hbm [shape: f32[256,256], index: 3, kind: input, shape index: {}]   ;;  %s889_s4 = inlined_call_operand.vmem [shape: f32[1,256], index: 4, kind: input, shape index: {}]   ;;  %s890_s5 = inlined_call_operand.hbm [shape: f32[256,128], index: 5, kind: input, shape index: {}]   ;;  %s891_s6 = inlined_call_operand.vmem [shape: f32[1,128], index: 6, kind: input, shape index: {}]   ;;  %s892_s7 = inlined_call_operand.hbm [shape: f32[2,128], index: 7, kind: output, shape index: {}]  }
   0x1   :  { %13 = vsyncpa [#allocation6], 0 }
   0x2   :  { %14 = vsyncpa [#allocation9], 0 }
   0x3   :  { %15 = vsyncpa [#allocation4], 0 }
   0x4   :  { %20 = vsyncadd [#allocation3], 96  ;;  %s745_s24 = smov [#allocation5]   ;;  %s627_s28 = scalar_lea.hbm %s886_s1, 2048 }
   0x5   :  { %s33_s25 = sshll.u32 %s745_s24, 4  ;;  %p628_p0 = scmp.ne.s32.totalorder %s886_s1, %s627_s28  ;;  %s34_s25 = int_to_ptr.vmem [resolvable:$true] %s33_s25 }
   0x6   :  { %p631_p1 = scmp.lt.u32.totalorder %s627_s28, %s886_s1 }
   0x8   :  { %p633_p2 = pnand %p631_p1, %p628_p0 }
   0xa   :  { %636 = shalt.err (!%p633_p2)
}
   0xb   :  { %s637_s10 = scalar_lea.vmem %s34_s25, 2048  ;;  %p642_p4 = scmp.lt.s32.totalorder %s34_s25, %s34_s25 }
   0xc   :  { %p638_p3 = scmp.ne.s32.totalorder %s34_s25, %s637_s10  ;;  %p643_p5 = scmp.lt.s32.totalorder %s637_s10, %s637_s10 }
   0xe   :  { %p644_p6 = por %p643_p5, %p642_p4 }
  0x10   :  { %p645_p7 = pnand %p644_p6, %p638_p3 }
  0x12   :  { %648 = shalt.err (!%p645_p7)
}
  0x13   :  { %s746_s11 = smov 256   ;;  %s747_s12 = smov 16  }
  0x14   :  { %39 = dma.hbm_to_vmem [thread:$0]  %s886_s1, 2048, %s34_s25, [#allocation6], %s746_s11, %s746_s11, %s747_s12  }
  0x15   :  { %s748_s15 = smov [#allocation2]   ;;  %s649_s19 = scalar_lea.hbm %s885_s0, 32 }
  0x16   :  { %s21_s16 = sshll.u32 %s748_s15, 4  ;;  %p650_p8 = scmp.ne.s32.totalorder %s885_s0, %s649_s19  ;;  %s22_s16 = int_to_ptr.vmem [resolvable:$true] %s21_s16 }
  0x17   :  { %p653_p9 = scmp.lt.u32.totalorder %s649_s19, %s885_s0 }
  0x19   :  { %p655_p10 = pnand %p653_p9, %p650_p8 }
  0x1b   :  { %658 = shalt.err (!%p655_p10)
}
  0x1c   :  { %s659_s24 = scalar_lea.vmem %s22_s16, 32  ;;  %s663_s1 = scalar_lea.vmem %s22_s16, 128 }
  0x1d   :  { %p660_p11 = scmp.ne.s32.totalorder %s22_s16, %s659_s24  ;;  %p664_p12 = scmp.lt.s32.totalorder %s22_s16, %s22_s16 }
  0x1e   :  { %p665_p13 = scmp.lt.s32.totalorder %s663_s1, %s659_s24 }
  0x20   :  { %p666_p0 = por %p665_p13, %p664_p12 }
  0x22   :  { %p667_p1 = pnand %p666_p0, %p660_p11 }
  0x24   :  { %670 = shalt.err (!%p667_p1)
}
  0x25   :  { %s749_s25 = smov 32   ;;  %s750_s26 = smov 2  }
  0x26   :  { %27 = dma.hbm_to_vmem [thread:$0]  %s885_s0, 32, %s22_s16, [#allocation3], %s749_s25, %s749_s25, %s750_s26  }
  0x27   :  { %s751_s29 = smov [#allocation7]   ;;  %s752_s8 = smov [#allocation8]  }
  0x28   :  { %s47_s30 = sshll.u32 %s751_s29, 4  ;;  %s61_s9 = sshll.u32 %s752_s8, 4  ;;  %s48_s30 = int_to_ptr.vmem [resolvable:$true] %s47_s30  ;;  %s827_s9 = int_to_ptr.vmem [resolvable:$true] %s61_s9 }
  0x29   :  { %s671_s14 = scalar_lea.hbm %s888_s3, 8192 }
  0x2a   :  { %p672_p2 = scmp.ne.s32.totalorder %s888_s3, %s671_s14  ;;  %p675_p3 = scmp.lt.u32.totalorder %s671_s14, %s888_s3 }
  0x2c   :  { %p677_p4 = pnand %p675_p3, %p672_p2 }
  0x2e   :  { %680 = shalt.err (!%p677_p4)
}
  0x2f   :  { %s681_s0 = scalar_lea.vmem %s48_s30, 8192  ;;  %p686_p6 = scmp.lt.s32.totalorder %s48_s30, %s48_s30 }
  0x30   :  { %p682_p5 = scmp.ne.s32.totalorder %s48_s30, %s681_s0  ;;  %p687_p7 = scmp.lt.s32.totalorder %s681_s0, %s681_s0 }
  0x32   :  { %p688_p8 = por %p687_p7, %p686_p6 }
  0x34   :  { %p689_p9 = pnand %p688_p8, %p682_p5 }
  0x36   :  { %692 = shalt.err (!%p689_p9)
}
  0x37   :  { %53 = dma.hbm_to_vmem [thread:$0]  %s888_s3, 8192, %s48_s30, [#allocation6], %s746_s11, %s746_s11, %s747_s12  }
  0x38   :  { %s693_s23 = scalar_lea.hbm %s890_s5, 4096 }
  0x39   :  { %p694_p10 = scmp.ne.s32.totalorder %s890_s5, %s693_s23  ;;  %p697_p11 = scmp.lt.u32.totalorder %s693_s23, %s890_s5 }
  0x3b   :  { %p699_p12 = pnand %p697_p11, %p694_p10 }
  0x3d   :  { %702 = shalt.err (!%p699_p12)
}
  0x3e   :  { %s703_s29 = scalar_lea.vmem %s827_s9, 4096  ;;  %p708_p0 = scmp.lt.s32.totalorder %s827_s9, %s827_s9 }
  0x3f   :  { %p704_p13 = scmp.ne.s32.totalorder %s827_s9, %s703_s29  ;;  %p709_p1 = scmp.lt.s32.totalorder %s703_s29, %s703_s29 }
  0x41   :  { %p710_p2 = por %p709_p1, %p708_p0 }
  0x43   :  { %p711_p3 = pnand %p710_p2, %p704_p13 }
  0x45   :  { %714 = shalt.err (!%p711_p3)
}
  0x46   :  { %s753_s3 = smov 128   ;;  %s754_s11 = smov 8  }
  0x47   :  { %67 = dma.hbm_to_vmem [thread:$0]  %s890_s5, 4096, %s827_s9, [#allocation9], %s753_s3, %s753_s3, %s754_s11  }
  0x48   :  { %737 = dma.done.wait [#allocation3], 128  }
  0x49   :  { %738 = vsyncadd [#allocation3], 4294967168 }
  0x4a   :  { %739 = dma.done.wait [#allocation6], 10240  }
  0x4b   :  { %740 = vsyncadd [#allocation6], 4294957056 }
  0x4c   :  { %741 = dma.done.wait [#allocation9], 4096  }
  0x4d   :  { %742 = vsyncadd [#allocation9], 4294963200  ;;  %v755_v0 = vmov 0.0   ;;  %v84_v1 = vld [vmem:[#allocation5 + $0x8] sm:$0xff]  ;;  %v86_v2 = vld [vmem:[#allocation5 + $0x18] sm:$0xff]  ;;  %vm111_vm0 = vcmask 523264  }
  0x4e   :  { %179 = vmatprep.mubr.f32.mxu0 %v755_v0  ;;  %v83_v3 = vld [vmem:[#allocation5] sm:$0xff]  ;;  %v503_v4 = vpack.c.bf16 %v86_v2, %v84_v1  ;;  %v85_v5 = vld [vmem:[#allocation5 + $0x10] sm:$0xff]  ;;  %v88_v6 = vld [vmem:[#allocation5 + $0x28] sm:$0xff] }
  0x4f   :  { %v90_v7 = vld [vmem:[#allocation5 + $0x38] sm:$0xff]  ;;  %v505_v8 = vpack.c.bf16 %v85_v5, %v83_v3  ;;  %v87_v10 = vld [vmem:[#allocation5 + $0x20] sm:$0xff]  ;;  %v89_v11 = vld [vmem:[#allocation5 + $0x30] sm:$0xff] }
  0x50   :  { %v507_v9 = vpack.c.bf16 %v90_v7, %v88_v6  ;;  %v92_v12 = vld [vmem:[#allocation5 + $0x48] sm:$0xff]  ;;  %504 = vmatprep.subr.bf16.mxu0 %v503_v4  ;;  %v94_v13 = vld [vmem:[#allocation5 + $0x58] sm:$0xff]  ;;  %v509_v14 = vpack.c.bf16 %v89_v11, %v87_v10  ;;  %v91_v15 = vld [vmem:[#allocation5 + $0x40] sm:$0xff] }
  0x51   :  { %506 = vmatpush1.bf16.msra.mxu0 %v505_v8  ;;  %v93_v16 = vld [vmem:[#allocation5 + $0x50] sm:$0xff]  ;;  %v511_v17 = vpack.c.bf16 %v94_v13, %v92_v12  ;;  %v96_v18 = vld [vmem:[#allocation5 + $0x68] sm:$0xff]  ;;  %v98_v19 = vld [vmem:[#allocation5 + $0x78] sm:$0xff] }
  0x52   :  { %508 = vmatprep.subr.bf16.mxu0 %v507_v9  ;;  %v189_v20 = vld [vmem:[#allocation7 + $0x8] sm:$0xff]  ;;  %v191_v21 = vld [vmem:[#allocation7 + $0x18] sm:$0xff]  ;;  %v188_v22 = vld [vmem:[#allocation7] sm:$0xff]  ;;  %v513_v29 = vpack.c.bf16 %v93_v16, %v91_v15  ;;  %v515_v34 = vpack.c.bf16 %v98_v19, %v96_v18 }
  0x53   :  { %v190_v23 = vld [vmem:[#allocation7 + $0x10] sm:$0xff]  ;;  %v519_v24 = vpack.c.bf16 %v191_v21, %v189_v20  ;;  %v193_v26 = vld [vmem:[#allocation7 + $0x28] sm:$0xff]  ;;  %v195_v27 = vld [vmem:[#allocation7 + $0x38] sm:$0xff] }
  0x54   :  { %v521_v25 = vpack.c.bf16 %v190_v23, %v188_v22  ;;  %v192_v28 = vld [vmem:[#allocation7 + $0x20] sm:$0xff]  ;;  %v523_v30 = vpack.c.bf16 %v195_v27, %v193_v26  ;;  %v194_v31 = vld [vmem:[#allocation7 + $0x30] sm:$0xff]  ;;  %v197_v32 = vld [vmem:[#allocation7 + $0x48] sm:$0xff] }
  0x55   :  { %510 = vmatpush1.bf16.msra.mxu0 %v509_v14  ;;  %v199_v33 = vld [vmem:[#allocation7 + $0x58] sm:$0xff]  ;;  %v95_v35 = vld [vmem:[#allocation5 + $0x60] sm:$0xff]  ;;  %v97_v36 = vld [vmem:[#allocation5 + $0x70] sm:$0xff]  ;;  %520 = vmatprep.subr.bf16.mxu1 %v519_v24  ;;  %v525_v37 = vpack.c.bf16 %v194_v31, %v192_v28 }
  0x56   :  { %512 = vmatprep.subr.bf16.mxu0 %v511_v17  ;;  %522 = vmatpush1.bf16.msra.mxu1 %v521_v25  ;;  %v527_v38 = vpack.c.bf16 %v199_v33, %v197_v32  ;;  %v196_v39 = vld [vmem:[#allocation7 + $0x40] sm:$0xff]  ;;  %v198_v40 = vld [vmem:[#allocation7 + $0x50] sm:$0xff]  ;;  %v517_v41 = vpack.c.bf16 %v97_v36, %v95_v35  ;;  %v201_v42 = vld [vmem:[#allocation7 + $0x68] sm:$0xff] }
  0x57   :  { %524 = vmatprep.subr.bf16.mxu1 %v523_v30  ;;  %v203_v43 = vld [vmem:[#allocation7 + $0x78] sm:$0xff]  ;;  %v529_v44 = vpack.c.bf16 %v198_v40, %v196_v39  ;;  %v200_v46 = vld [vmem:[#allocation7 + $0x60] sm:$0xff]  ;;  %v202_v47 = vld [vmem:[#allocation7 + $0x70] sm:$0xff] }
  0x58   :  { %v531_v45 = vpack.c.bf16 %v203_v43, %v201_v42  ;;  %v82_v48 = vld [vmem:[#allocation2] sm:$0xff]  ;;  %v205_v49 = vld [vmem:[#allocation7 + $0x88] sm:$0xff]  ;;  %v533_v51 = vpack.c.bf16 %v202_v47, %v200_v46  ;;  %v204_v53 = vld [vmem:[#allocation7 + $0x80] sm:$0xff] }
  0x59   :  { %514 = vmatpush1.bf16.msra.mxu0 %v513_v29  ;;  %v207_v50 = vld [vmem:[#allocation7 + $0x98] sm:$0xff]  ;;  %v206_v54 = vld [vmem:[#allocation7 + $0x90] sm:$0xff]  ;;  %v209_v55 = vld [vmem:[#allocation7 + $0xa8] sm:$0xff] }
  0x5a   :  { %516 = vmatprep.subr.bf16.mxu0 %v515_v34  ;;  %526 = vmatpush1.bf16.msra.mxu1 %v525_v37  ;;  %v535_v52 = vpack.c.bf16 %v207_v50, %v205_v49  ;;  %v211_v56 = vld [vmem:[#allocation7 + $0xb8] sm:$0xff]  ;;  %v537_v57 = vpack.c.bf16 %v206_v54, %v204_v53  ;;  %v208_v59 = vld [vmem:[#allocation7 + $0xa0] sm:$0xff]  ;;  %v210_v60 = vld [vmem:[#allocation7 + $0xb0] sm:$0xff] }
  0x5b   :  { %528 = vmatprep.subr.bf16.mxu1 %v527_v38  ;;  %v539_v58 = vpack.c.bf16 %v211_v56, %v209_v55  ;;  %v213_v61 = vld [vmem:[#allocation7 + $0xc8] sm:$0xff]  ;;  %v215_v62 = vld [vmem:[#allocation7 + $0xd8] sm:$0xff]  ;;  %v541_v63 = vpack.c.bf16 %v210_v60, %v208_v59  ;;  %v212_v1 = vld [vmem:[#allocation7 + $0xc0] sm:$0xff] }
  0x5c   :  { %v543_v0 = vpack.c.bf16 %v215_v62, %v213_v61  ;;  %v214_v2 = vld [vmem:[#allocation7 + $0xd0] sm:$0xff]  ;;  %v217_v3 = vld [vmem:[#allocation7 + $0xe8] sm:$0xff]  ;;  %v219_v4 = vld [vmem:[#allocation7 + $0xf8] sm:$0xff] }
  0x5d   :  { %518 = vmatpush1.bf16.msra.mxu0 %v517_v41  ;;  %v545_v5 = vpack.c.bf16 %v214_v2, %v212_v1  ;;  %v547_v6 = vpack.c.bf16 %v219_v4, %v217_v3  ;;  %v216_v7 = vld [vmem:[#allocation7 + $0xe0] sm:$0xff]  ;;  %v218_v8 = vld [vmem:[#allocation7 + $0xf0] sm:$0xff]  ;;  %v221_v9 = vld [vmem:[#allocation7 + $0x108] sm:$0xff] }
  0x5e   :  { %530 = vmatpush1.bf16.msra.mxu1 %v529_v44  ;;  %v223_v10 = vld [vmem:[#allocation7 + $0x118] sm:$0xff]  ;;  %v549_v11 = vpack.c.bf16 %v218_v8, %v216_v7  ;;  %v220_v13 = vld [vmem:[#allocation7 + $0x100] sm:$0xff]  ;;  %v222_v14 = vld [vmem:[#allocation7 + $0x110] sm:$0xff] }
  0x5f   :  { %532 = vmatprep.subr.bf16.mxu1 %v531_v45  ;;  %v551_v12 = vpack.c.bf16 %v223_v10, %v221_v9  ;;  %v225_v15 = vld [vmem:[#allocation7 + $0x128] sm:$0xff]  ;;  %v227_v16 = vld [vmem:[#allocation7 + $0x138] sm:$0xff]  ;;  %v553_v17 = vpack.c.bf16 %v222_v14, %v220_v13  ;;  %v224_v19 = vld [vmem:[#allocation7 + $0x120] sm:$0xff] }
  0x60   :  { %466 = vmatmul.mubr.msk.f32.vlgmr.msra.gmra.mrb[0].mxu0 %vm111_vm0, %v82_v48  ;;  %v555_v18 = vpack.c.bf16 %v227_v16, %v225_v15  ;;  %v226_v20 = vld [vmem:[#allocation7 + $0x130] sm:$0xff]  ;;  %v229_v21 = vld [vmem:[#allocation7 + $0x148] sm:$0xff]  ;;  %v231_v22 = vld [vmem:[#allocation7 + $0x158] sm:$0xff] }
  0x61   :  { %v557_v23 = vpack.c.bf16 %v226_v20, %v224_v19  ;;  %v559_v24 = vpack.c.bf16 %v231_v22, %v229_v21  ;;  %v228_v25 = vld [vmem:[#allocation7 + $0x140] sm:$0xff]  ;;  %v230_v26 = vld [vmem:[#allocation7 + $0x150] sm:$0xff]  ;;  %v233_v27 = vld [vmem:[#allocation7 + $0x168] sm:$0xff] }
  0x62   :  { %534 = vmatpush1.bf16.msra.mxu1 %v533_v51  ;;  %v235_v28 = vld [vmem:[#allocation7 + $0x178] sm:$0xff]  ;;  %v561_v29 = vpack.c.bf16 %v230_v26, %v228_v25  ;;  %v232_v31 = vld [vmem:[#allocation7 + $0x160] sm:$0xff]  ;;  %v234_v32 = vld [vmem:[#allocation7 + $0x170] sm:$0xff] }
  0x63   :  { %536 = vmatprep.subr.bf16.mxu1 %v535_v52  ;;  %v563_v30 = vpack.c.bf16 %v235_v28, %v233_v27  ;;  %v237_v33 = vld [vmem:[#allocation7 + $0x188] sm:$0xff]  ;;  %v239_v34 = vld [vmem:[#allocation7 + $0x198] sm:$0xff]  ;;  %v565_v35 = vpack.c.bf16 %v234_v32, %v232_v31  ;;  %v236_v37 = vld [vmem:[#allocation7 + $0x180] sm:$0xff] }
  0x64   :  { %v567_v36 = vpack.c.bf16 %v239_v34, %v237_v33  ;;  %v238_v38 = vld [vmem:[#allocation7 + $0x190] sm:$0xff]  ;;  %v241_v39 = vld [vmem:[#allocation7 + $0x1a8] sm:$0xff]  ;;  %v243_v40 = vld [vmem:[#allocation7 + $0x1b8] sm:$0xff]  ;;  %v101_v33 = vlaneseq }
  0x65   :  { %v569_v41 = vpack.c.bf16 %v238_v38, %v236_v37  ;;  %v571_v42 = vpack.c.bf16 %v243_v40, %v241_v39  ;;  %v240_v43 = vld [vmem:[#allocation7 + $0x1a0] sm:$0xff]  ;;  %v242_v44 = vld [vmem:[#allocation7 + $0x1b0] sm:$0xff]  ;;  %v245_v45 = vld [vmem:[#allocation7 + $0x1c8] sm:$0xff] }
  0x66   :  { %538 = vmatpush1.bf16.msra.mxu1 %v537_v57  ;;  %v247_v46 = vld [vmem:[#allocation7 + $0x1d8] sm:$0xff]  ;;  %v573_v47 = vpack.c.bf16 %v242_v44, %v240_v43  ;;  %v244_v49 = vld [vmem:[#allocation7 + $0x1c0] sm:$0xff]  ;;  %v246_v50 = vld [vmem:[#allocation7 + $0x1d0] sm:$0xff]  ;;  %v102_v34 = vshrl.u32 %v101_v33, 7 }
  0x67   :  { %540 = vmatprep.subr.bf16.mxu1 %v539_v58  ;;  %v575_v48 = vpack.c.bf16 %v247_v46, %v245_v45  ;;  %v577_v51 = vpack.c.bf16 %v246_v50, %v244_v49  ;;  %v249_v52 = vld [vmem:[#allocation7 + $0x1e8] sm:$0xff]  ;;  %v251_v53 = vld [vmem:[#allocation7 + $0x1f8] sm:$0xff]  ;;  %v248_v55 = vld [vmem:[#allocation7 + $0x1e0] sm:$0xff] }
  0x68   :  { %v579_v54 = vpack.c.bf16 %v251_v53, %v249_v52  ;;  %v250_v56 = vld [vmem:[#allocation7 + $0x1f0] sm:$0xff]  ;;  %v353_v58 = vld [vmem:[#allocation8 + $0x80] sm:$0xff]  ;;  %v354_v59 = vld [vmem:[#allocation8 + $0x88] sm:$0xff]  ;;  %v107_v37 = vsub.s32 1, %v102_v34 }
  0x69   :  { %v581_v57 = vpack.c.bf16 %v250_v56, %v248_v55  ;;  %v337_v60 = vld [vmem:[#allocation8] sm:$0xff]  ;;  %v583_v61 = vpack.c.bf16 %v354_v59, %v353_v58  ;;  %v338_v62 = vld [vmem:[#allocation8 + $0x8] sm:$0xff]  ;;  %v339_v3 = vld [vmem:[#allocation8 + $0x10] sm:$0xff] }
  0x6a   :  { %542 = vmatpush1.bf16.msra.mxu1 %v541_v63  ;;  %v355_v63 = vld [vmem:[#allocation8 + $0x90] sm:$0xff]  ;;  %v585_v1 = vpack.c.bf16 %v338_v62, %v337_v60  ;;  %v340_v4 = vld [vmem:[#allocation8 + $0x18] sm:$0xff]  ;;  %v341_v9 = vld [vmem:[#allocation8 + $0x20] sm:$0xff] }
  0x6b   :  { %544 = vmatprep.subr.bf16.mxu1 %v543_v0  ;;  %v356_v0 = vld [vmem:[#allocation8 + $0x98] sm:$0xff]  ;;  %584 = vmatprep.subr.bf16.mxu0 %v583_v61  ;;  %v589_v7 = vpack.c.bf16 %v340_v4, %v339_v3  ;;  %v342_v10 = vld [vmem:[#allocation8 + $0x28] sm:$0xff]  ;;  %v343_v15 = vld [vmem:[#allocation8 + $0x30] sm:$0xff] }
  0x6c   :  { %v587_v2 = vpack.c.bf16 %v356_v0, %v355_v63  ;;  %586 = vmatpush3.bf16.msra.mxu0 %v585_v1  ;;  %v593_v13 = vpack.c.bf16 %v342_v10, %v341_v9  ;;  %v344_v16 = vld [vmem:[#allocation8 + $0x38] sm:$0xff]  ;;  %v345_v21 = vld [vmem:[#allocation8 + $0x40] sm:$0xff]  ;;  %v346_v22 = vld [vmem:[#allocation8 + $0x48] sm:$0xff] }
  0x6d   :  { %v597_v19 = vpack.c.bf16 %v344_v16, %v343_v15  ;;  %v601_v25 = vpack.c.bf16 %v346_v22, %v345_v21  ;;  %v347_v27 = vld [vmem:[#allocation8 + $0x50] sm:$0xff]  ;;  %v348_v28 = vld [vmem:[#allocation8 + $0x58] sm:$0xff]  ;;  %v349_v46 = vld [vmem:[#allocation8 + $0x60] sm:$0xff] }
  0x6e   :  { %546 = vmatpush1.bf16.msra.mxu1 %v545_v5  ;;  %v357_v5 = vld [vmem:[#allocation8 + $0xa0] sm:$0xff]  ;;  %588 = vmatprep.subr.bf16.mxu0 %v587_v2  ;;  %v605_v31 = vpack.c.bf16 %v348_v28, %v347_v27  ;;  %v367_v49 = vld [vmem:[#allocation8 + $0xf0] sm:$0xff]  ;;  %v368_v50 = vld [vmem:[#allocation8 + $0xf8] sm:$0xff] }
  0x6f   :  { %548 = vmatprep.subr.bf16.mxu1 %v547_v6  ;;  %v358_v6 = vld [vmem:[#allocation8 + $0xa8] sm:$0xff]  ;;  %v351_v52 = vld [vmem:[#allocation8 + $0x70] sm:$0xff]  ;;  %v352_v53 = vld [vmem:[#allocation8 + $0x78] sm:$0xff] }
  0x70   :  { %v591_v8 = vpack.c.bf16 %v358_v6, %v357_v5  ;;  %590 = vmatpush3.bf16.msra.mxu0 %v589_v7  ;;  %v252_v55 = vld [vmem:[%s889_s4] sm:$0x3] }
  0x71   :  { %v467_v1 = vld [vmem:[%s891_s6] ss:$0 sm:$0xff] }
  0x72   :  { %550 = vmatpush1.bf16.msra.mxu1 %v549_v11  ;;  %v359_v11 = vld [vmem:[#allocation8 + $0xb0] sm:$0xff]  ;;  %592 = vmatprep.subr.bf16.mxu0 %v591_v8 }
  0x73   :  { %552 = vmatprep.subr.bf16.mxu1 %v551_v12  ;;  %v360_v12 = vld [vmem:[#allocation8 + $0xb8] sm:$0xff] }
  0x74   :  { %v595_v14 = vpack.c.bf16 %v360_v12, %v359_v11  ;;  %594 = vmatpush3.bf16.msra.mxu0 %v593_v13 }
  0x76   :  { %554 = vmatpush1.bf16.msra.mxu1 %v553_v17  ;;  %v361_v17 = vld [vmem:[#allocation8 + $0xc0] sm:$0xff]  ;;  %596 = vmatprep.subr.bf16.mxu0 %v595_v14 }
  0x77   :  { %556 = vmatprep.subr.bf16.mxu1 %v555_v18  ;;  %v362_v18 = vld [vmem:[#allocation8 + $0xc8] sm:$0xff] }
  0x78   :  { %v599_v20 = vpack.c.bf16 %v362_v18, %v361_v17  ;;  %598 = vmatpush3.bf16.msra.mxu0 %v597_v19 }
  0x7a   :  { %558 = vmatpush1.bf16.msra.mxu1 %v557_v23  ;;  %v363_v23 = vld [vmem:[#allocation8 + $0xd0] sm:$0xff]  ;;  %600 = vmatprep.subr.bf16.mxu0 %v599_v20 }
  0x7b   :  { %560 = vmatprep.subr.bf16.mxu1 %v559_v24  ;;  %v364_v24 = vld [vmem:[#allocation8 + $0xd8] sm:$0xff] }
  0x7c   :  { %v603_v26 = vpack.c.bf16 %v364_v24, %v363_v23  ;;  %602 = vmatpush3.bf16.msra.mxu0 %v601_v25 }
  0x7e   :  { %562 = vmatpush1.bf16.msra.mxu1 %v561_v29  ;;  %v365_v29 = vld [vmem:[#allocation8 + $0xe0] sm:$0xff]  ;;  %604 = vmatprep.subr.bf16.mxu0 %v603_v26 }
  0x7f   :  { %564 = vmatprep.subr.bf16.mxu1 %v563_v30  ;;  %v366_v30 = vld [vmem:[#allocation8 + $0xe8] sm:$0xff] }
  0x80   :  { %v607_v32 = vpack.c.bf16 %v366_v30, %v365_v29  ;;  %606 = vmatpush3.bf16.msra.mxu0 %v605_v31 }
  0x82   :  { %566 = vmatpush1.bf16.msra.mxu1 %v565_v35  ;;  %608 = vmatprep.subr.bf16.mxu0 %v607_v32  ;;  %v103_v35 = vsub.s32 0, %v102_v34 }
  0x83   :  { %568 = vmatprep.subr.bf16.mxu1 %v567_v36  ;;  %v99_v36 = vld [vmem:[%s887_s2] sm:$0x3] }
  0x84   :  { %v104_v38 = vrot.slane %v99_v36, %v103_v35  ;;  %v108_v39 = vrot.slane %v99_v36, %v107_v37  ;;  %v257_v56 = vrot.slane %v252_v55, %v103_v35 }
  0x86   :  { %570 = vmatpush1.bf16.msra.mxu1 %v569_v41 }
  0x87   :  { %572 = vmatprep.subr.bf16.mxu1 %v571_v42 }
  0x8a   :  { %574 = vmatpush1.bf16.msra.mxu1 %v573_v47  ;;  %v350_v47 = vld [vmem:[#allocation8 + $0x68] sm:$0xff] }
  0x8b   :  { %576 = vmatprep.subr.bf16.mxu1 %v575_v48  ;;  %v609_v48 = vpack.c.bf16 %v350_v47, %v349_v46 }
  0x8d   :  { %610 = vmatpush3.bf16.msra.mxu0 %v609_v48 }
  0x8e   :  { %578 = vmatpush1.bf16.msra.mxu1 %v577_v51  ;;  %v611_v51 = vpack.c.bf16 %v368_v50, %v367_v49 }
  0x8f   :  { %580 = vmatprep.subr.bf16.mxu1 %v579_v54  ;;  %v613_v54 = vpack.c.bf16 %v352_v53, %v351_v52 }
  0x90   :  { %612 = vmatprep.subr.bf16.mxu0 %v611_v51 }
  0x91   :  { %614 = vmatpush3.bf16.msra.mxu0 %v613_v54 }
  0x92   :  { %582 = vmatpush1.bf16.msra.mxu1 %v581_v57  ;;  %v261_v57 = vrot.slane %v252_v55, %v107_v37 }
 0x133   :  { %v181_v40 = vpop.f32.mrb[0].mxu0 }
 0x134   :  { %v182_v41 = vadd.f32 %v181_v40, %v104_v38  ;;  %v183_v42 = vpop.f32.mrb[1].mxu0 }
 0x135   :  { %v184_v43 = vadd.f32 %v183_v42, %v108_v39 }
 0x136   :  { %v186_v45 = vmax.f32 %v182_v41, 0.0 }
 0x137   :  { %v187_v44 = vmax.f32 %v184_v43, 0.0 }
 0x139   :  { %328 = vmatprep.mubr.f32.mxu1 %v187_v44 }
 0x13a   :  { %329 = vmatmul.mubr.f32.vlgmr.msra.gmra.mrb[0].mxu1 %v186_v45 }
 0x20d   :  { %v330_v58 = vpop.f32.mrb[0].mxu1 }
 0x20e   :  { %v331_v59 = vadd.f32 %v330_v58, %v257_v56  ;;  %v332_v60 = vpop.f32.mrb[1].mxu1 }
 0x20f   :  { %v333_v61 = vadd.f32 %v332_v60, %v261_v57 }
 0x210   :  { %v335_v63 = vmax.f32 %v331_v59, 0.0 }
 0x211   :  { %v336_v62 = vmax.f32 %v333_v61, 0.0 }
 0x213   :  { %440 = vmatprep.mubr.f32.mxu0 %v336_v62 }
 0x214   :  { %441 = vmatmul.mubr.f32.vlgmr.msra.gmra.mrb[2].mxu0 %v335_v63 }
 0x2e7   :  { %v500_v0 = vpop.f32.mrb[2].mxu0 }
 0x2e8   :  { %v501_v2 = vpop.f32.mrb[3].mxu0 }
 0x2e9   :  { %v502_v3 = vadd.f32 %v501_v2, %v500_v0 }
 0x2eb   :  { %v443_v4 = vadd.f32 %v502_v3, %v467_v1 }
 0x2ed   :  { %446 = vst [vmem:[#allocation10] sm:$0xff] %v443_v4 }
 0x2ee   :  { %451 = vsyncadd [#allocation4], 96  ;;  %s756_s4 = smov [#allocation10]  }
 0x2ef   :  { %s452_s14 = sshll.u32 %s756_s4, 4  ;;  %s453_s14 = int_to_ptr.vmem [resolvable:$true] %s452_s14 }
 0x2f0   :  { %s715_s15 = scalar_lea.vmem %s453_s14, 32  ;;  %s719_s17 = scalar_lea.vmem %s453_s14, 128 }
 0x2f1   :  { %p716_p4 = scmp.ne.s32.totalorder %s453_s14, %s715_s15  ;;  %p720_p5 = scmp.lt.s32.totalorder %s453_s14, %s453_s14 }
 0x2f2   :  { %p721_p6 = scmp.lt.s32.totalorder %s719_s17, %s715_s15 }
 0x2f4   :  { %p722_p7 = por %p721_p6, %p720_p5 }
 0x2f6   :  { %p723_p8 = pnand %p722_p7, %p716_p4 }
 0x2f8   :  { %726 = shalt.err (!%p723_p8)
}
 0x2f9   :  { %s727_s6 = scalar_lea.hbm %s892_s7, 32 }
 0x2fa   :  { %p728_p9 = scmp.ne.s32.totalorder %s892_s7, %s727_s6  ;;  %p731_p10 = scmp.lt.u32.totalorder %s727_s6, %s892_s7 }
 0x2fc   :  { %p733_p11 = pnand %p731_p10, %p728_p9 }
 0x2fe   :  { %736 = shalt.err (!%p733_p11)
}
 0x2ff   :  { %458 = dma.vmem_to_hbm [thread:$0]  %s453_s14, 32, %s892_s7, [#allocation4], %s749_s25, %s749_s25, %s750_s26  }
 0x300   :  { %743 = dma.done.wait [#allocation4], 128  }
 0x301   :  { %744 = vsyncadd [#allocation4], 4294967168 }
 0x302   :  { %462 = vsyncpa [#allocation3], 1 }
 0x303   :  { %463 = vsyncpa [#allocation6], 1 }
 0x304   :  { %464 = vsyncpa [#allocation9], 1 }
 0x305   :  { %465 = vsyncpa [#allocation4], 1 }

</bundles_post_ra>
